<compile_context>
chip_gen: v5e
topology: v5e:2x2
jax: 0.10.0
libtpu: 0.0.40
codegen_flags: <defaults>
</compile_context>

<pallas_src>
import jax
import jax.numpy as jnp
from jax.experimental import pallas as pl
from jax.experimental.pallas import tpu as pltpu


_VMEM_BUDGET_BYTES = 24 * 1024 * 1024   # double-buffered working-set target (v7x-safe)


def _round_up(v, m):
    return ((v + m - 1) // m) * m


def _bbox_conv1x1_kernel(x_ref, w_ref, b_ref, o_ref):
    # x_ref: (nb, Cin, t)  spatial-major tile (lanes = spatial, dense loads)
    # w_ref: (Cout, Cin)   resident in VMEM (constant index_map)
    # b_ref: (Cout, 1)     resident in VMEM, f32
    # o_ref: (nb, Cout, t) lane-dense stores
    w = w_ref[...]
    b = b_ref[...]
    for n in range(x_ref.shape[0]):                       # static unroll, nb is small
        acc = jnp.dot(w, x_ref[n],
                      preferred_element_type=jnp.float32)  # (Cout, t) on MXU, f32 acc
        o_ref[n] = (acc + b).astype(o_ref.dtype)           # bias lane-broadcast


def _pick_tiles(N, Cin, Cout, HW, t_hw, in_bytes, out_bytes):
    """Choose (batch block nb, spatial tile t)."""
    cout_p = _round_up(Cout, 8)
    # Double-buffered input + output block bytes per spatial lane per image.
    per_lane = 2 * (Cin * in_bytes + cout_p * out_bytes)
    t_vmem = max(128, (_VMEM_BUDGET_BYTES // per_lane) // 128 * 128)
    t_cap = max(128, (min(t_hw, t_vmem) // 128) * 128)

    if HW <= t_cap:
        t = HW                                  # single spatial block (== full dim, legal)
        if N == 1 and HW >= 256:
            # v7x megacore: give the second TensorCore its own spatial block.
            t = _round_up(pl.cdiv(HW, 2), 128)
    else:
        t = t_cap                               # multiple of 128; last block is ragged

    # Small feature maps (late FPN levels): batch several images per grid step
    # to amortize the per-step overhead.
    nb = 1
    if t < 512:
        nb = int(min(N, max(1, 512 // t)))
        nb = max(1, min(nb, _VMEM_BUDGET_BYTES // (per_lane * t)))
    return nb, t


def bbox_head_forward(x_nchw, weight, bias, num_anchors, *,
                      t_hw=2048, compute_dtype=jnp.bfloat16, out_dtype=None):
    """Pallas-TPU equivalent of BboxHead.forward.

    x_nchw: (N, Cin, H, W); weight: (Cout, Cin) or (Cout, Cin, 1, 1); bias: (Cout,).
    Returns (N, H*W*num_anchors, 4), matching permute(0,2,3,1).view(N, -1, 4).
    """
    N, Cin, H, W = x_nchw.shape
    if weight.ndim == 4:                                   # conv weight (Cout, Cin, 1, 1)
        weight = weight.reshape(weight.shape[0], weight.shape[1])
    Cout = weight.shape[0]
    assert Cout == num_anchors * 4
    assert weight.shape[1] == Cin

    out_dtype = x_nchw.dtype if out_dtype is None else out_dtype
    compute_dtype = x_nchw.dtype if compute_dtype is None else compute_dtype
    in_bytes = jnp.dtype(compute_dtype).itemsize
    out_bytes = jnp.dtype(out_dtype).itemsize

    HW = H * W
    nb, t = _pick_tiles(N, Cin, Cout, HW, t_hw, in_bytes, out_bytes)
    grid = (pl.cdiv(N, nb), pl.cdiv(HW, t))

    # bf16 at the boundary: halves HBM reads of the big tensor; accumulation in
    # the kernel stays f32 via preferred_element_type.
    x_flat = x_nchw.reshape(N, Cin, HW).astype(compute_dtype)
    w_oc = weight.astype(compute_dtype)                    # (Cout, Cin)
    b_col = bias.astype(jnp.float32).reshape(Cout, 1)      # (Cout, 1)

    out_nchw = pl.pallas_call(
        _bbox_conv1x1_kernel,
        out_shape=jax.ShapeDtypeStruct((N, Cout, HW), out_dtype),
        grid_spec=pltpu.PrefetchScalarGridSpec(
            num_scalar_prefetch=0,
            grid=grid,
            in_specs=[
                pl.BlockSpec((nb, Cin, t), lambda ib, j: (ib, 0, j)),
                pl.BlockSpec((Cout, Cin), lambda ib, j: (0, 0)),   # resident weight
                pl.BlockSpec((Cout, 1), lambda ib, j: (0, 0)),     # resident bias
            ],
            out_specs=pl.BlockSpec((nb, Cout, t), lambda ib, j: (ib, 0, j)),
        ),
        compiler_params=pltpu.CompilerParams(
            dimension_semantics=("parallel", "parallel"),
            vmem_limit_bytes=32 * 1024 * 1024),
        cost_estimate=pl.CostEstimate(
            flops=2 * N * HW * Cin * Cout,
            transcendentals=0,
            bytes_accessed=(N * Cin * HW * in_bytes + Cout * Cin * in_bytes
                            + Cout * 4 + N * Cout * HW * out_bytes)),
    )(x_flat, w_oc, b_col)

    # permute(0,2,3,1).contiguous().view(N, -1, 4) equivalent — one XLA pass
    # over the small (N, Cout, HW) output.
    # TODO(synk): fuse this relayout into the kernel store (in-kernel transpose
    # of the (Cout, t) tile to a lane-dense (1, t*Cout) slab) once Mosaic's
    # minor-dim transpose of a 12-row tile is verified to lower on v5e/v6e/v7x.
    out = jnp.transpose(out_nchw, (0, 2, 1)).reshape(N, HW * num_anchors, 4)
    return out


if __name__ == "__main__":
    key = jax.random.PRNGKey(0)
    kx, kw, kb, kx2, kw2 = jax.random.split(key, 5)

    num_anchors = 3
    Cout = num_anchors * 4

    # Case 1: small feature map, batch-blocked single spatial tile.
    N, Cin, H, W = 2, 32, 16, 16
    x = jax.random.normal(kx, (N, Cin, H, W), dtype=jnp.float32)
    weight = jax.random.normal(kw, (Cout, Cin), dtype=jnp.float32) * 0.05
    bias = jax.random.normal(kb, (Cout,), dtype=jnp.float32) * 0.05

    out = jax.block_until_ready(bbox_head_forward(x, weight, bias, num_anchors))

    # Reference uses the same bf16-rounded inputs, f32 accumulation.
    xc = x.astype(jnp.bfloat16).astype(jnp.float32)
    wc = weight.astype(jnp.bfloat16).astype(jnp.float32)
    ref = (jnp.einsum("nchw,oc->nhwo", xc, wc) + bias).reshape(N, H * W * num_anchors, 4)
    assert out.shape == (N, H * W * num_anchors, 4)
    assert out.dtype == x.dtype
    assert jnp.allclose(out, ref, atol=1e-3, rtol=1e-3), float(jnp.max(jnp.abs(out - ref)))

    # Case 2: ragged spatial tiling (HW=400, tile=256 -> clipped last block).
    N2, Cin2, H2, W2 = 1, 64, 20, 20
    x2 = jax.random.normal(kx2, (N2, Cin2, H2, W2), dtype=jnp.float32)
    weight2 = jax.random.normal(kw2, (Cout, Cin2), dtype=jnp.float32) * 0.05

    out2 = jax.block_until_ready(
        bbox_head_forward(x2, weight2, bias, num_anchors, t_hw=256))

    x2c = x2.astype(jnp.bfloat16).astype(jnp.float32)
    w2c = weight2.astype(jnp.bfloat16).astype(jnp.float32)
    ref2 = (jnp.einsum("nchw,oc->nhwo", x2c, w2c) + bias).reshape(
        N2, H2 * W2 * num_anchors, 4)
    assert out2.shape == (N2, H2 * W2 * num_anchors, 4)
    assert jnp.allclose(out2, ref2, atol=1e-3, rtol=1e-3), float(jnp.max(jnp.abs(out2 - ref2)))

    print("KERNEL_OK")
</pallas_src>

<mosaic_0001>
module attributes {stable_mosaic.version = 11 : i64} {
  func.func @_bbox_conv1x1_kernel(%arg0: i32, %arg1: i32, %arg2: memref<2x32x256xbf16, #tpu.memory_space<vmem>>, %arg3: memref<12x32xbf16, #tpu.memory_space<vmem>>, %arg4: memref<12x1xf32, #tpu.memory_space<vmem>>, %arg5: memref<2x12x256xf32, #tpu.memory_space<vmem>>) attributes {dimension_semantics = [#tpu.dimension_semantics<parallel>, #tpu.dimension_semantics<parallel>], iteration_bounds = array<i64: 1, 1>, scalar_prefetch = 0 : i64, scratch_operands = 0 : i64, tpu.core_type = #tpu.core_type<tc>, window_params = [{transform_indices = @transform_0, window_bounds = array<i64: 2, 32, 256>}, {pipeline_mode = #tpu.pipeline_mode<synchronous>, transform_indices = @transform_1, window_bounds = array<i64: 12, 32>}, {pipeline_mode = #tpu.pipeline_mode<synchronous>, transform_indices = @transform_2, window_bounds = array<i64: 12, 1>}, {transform_indices = @transform_3, window_bounds = array<i64: 2, 12, 256>}]} {
    %c0 = arith.constant 0 : index
    %c0_0 = arith.constant 0 : index
    %0 = vector.load %arg3[%c0, %c0_0] : memref<12x32xbf16, #tpu.memory_space<vmem>>, vector<12x32xbf16>
    %c0_1 = arith.constant 0 : index
    %c0_2 = arith.constant 0 : index
    %1 = vector.load %arg4[%c0_1, %c0_2] : memref<12x1xf32, #tpu.memory_space<vmem>>, vector<12x1xf32>
    %c0_3 = arith.constant 0 : index
    %c0_4 = arith.constant 0 : index
    %c0_5 = arith.constant 0 : index
    %2 = vector.load %arg2[%c0_3, %c0_4, %c0_5] : memref<2x32x256xbf16, #tpu.memory_space<vmem>>, vector<1x32x256xbf16>
    %3 = vector.shape_cast %2 : vector<1x32x256xbf16> to vector<32x256xbf16>
    %cst = arith.constant dense<0.000000e+00> : vector<12x256xf32>
    %4 = tpu.matmul %0, %3, %cst {dimension_numbers = #tpu.dot_dimension_numbers<[1], [0], [0], [1], [0, 0, 1, 1], [], []>} : vector<12x32xbf16>, vector<32x256xbf16>, vector<12x256xf32> -> vector<12x256xf32>
    %5 = vector.broadcast %1 : vector<12x1xf32> to vector<12x256xf32>
    %6 = arith.addf %4, %5 : vector<12x256xf32>
    %c0_6 = arith.constant 0 : index
    %c0_7 = arith.constant 0 : index
    %c0_8 = arith.constant 0 : index
    %7 = vector.load %arg5[%c0_6, %c0_7, %c0_8] : memref<2x12x256xf32, #tpu.memory_space<vmem>>, vector<1x12x256xf32>
    %8 = vector.shape_cast %7 : vector<1x12x256xf32> to vector<12x256xf32>
    %9 = vector.shape_cast %6 : vector<12x256xf32> to vector<1x12x256xf32>
    tpu.vector_store %arg5[%c0_6, %c0_7, %c0_8], %9 {strides = array<i32>} : memref<2x12x256xf32, #tpu.memory_space<vmem>>, vector<1x12x256xf32>,
    %c1 = arith.constant 1 : index
    %c0_9 = arith.constant 0 : index
    %c0_10 = arith.constant 0 : index
    %10 = vector.load %arg2[%c1, %c0_9, %c0_10] : memref<2x32x256xbf16, #tpu.memory_space<vmem>>, vector<1x32x256xbf16>
    %11 = vector.shape_cast %10 : vector<1x32x256xbf16> to vector<32x256xbf16>
    %cst_11 = arith.constant dense<0.000000e+00> : vector<12x256xf32>
    %12 = tpu.matmul %0, %11, %cst_11 {dimension_numbers = #tpu.dot_dimension_numbers<[1], [0], [0], [1], [0, 0, 1, 1], [], []>} : vector<12x32xbf16>, vector<32x256xbf16>, vector<12x256xf32> -> vector<12x256xf32>
    %13 = vector.broadcast %1 : vector<12x1xf32> to vector<12x256xf32>
    %14 = arith.addf %12, %13 : vector<12x256xf32>
    %c1_12 = arith.constant 1 : index
    %c0_13 = arith.constant 0 : index
    %c0_14 = arith.constant 0 : index
    %15 = vector.load %arg5[%c1_12, %c0_13, %c0_14] : memref<2x12x256xf32, #tpu.memory_space<vmem>>, vector<1x12x256xf32>
    %16 = vector.shape_cast %15 : vector<1x12x256xf32> to vector<12x256xf32>
    %17 = vector.shape_cast %14 : vector<12x256xf32> to vector<1x12x256xf32>
    tpu.vector_store %arg5[%c1_12, %c0_13, %c0_14], %17 {strides = array<i32>} : memref<2x12x256xf32, #tpu.memory_space<vmem>>, vector<1x12x256xf32>,
    return
  }
  func.func @transform_0(%arg0: i32, %arg1: i32) -> (i32, i32, i32) {
    %c0_i32 = arith.constant 0 : i32
    %c0_i32_0 = arith.constant 0 : i32
    return %arg0, %c0_i32, %arg1 : i32, i32, i32
  }
  func.func @transform_1(%arg0: i32, %arg1: i32) -> (i32, i32) {
    %c0_i32 = arith.constant 0 : i32
    %c0_i32_0 = arith.constant 0 : i32
    %c0_i32_1 = arith.constant 0 : i32
    return %c0_i32, %c0_i32_0 : i32, i32
  }
  func.func @transform_2(%arg0: i32, %arg1: i32) -> (i32, i32) {
    %c0_i32 = arith.constant 0 : i32
    %c0_i32_0 = arith.constant 0 : i32
    %c0_i32_1 = arith.constant 0 : i32
    return %c0_i32, %c0_i32_0 : i32, i32
  }
  func.func @transform_3(%arg0: i32, %arg1: i32) -> (i32, i32, i32) {
    %c0_i32 = arith.constant 0 : i32
    %c0_i32_0 = arith.constant 0 : i32
    return %arg0, %c0_i32, %arg1 : i32, i32, i32
  }
}

</mosaic_0001>

<bundles_post_ra>
// kernel: tpu_custom_call.1
= control target key start
LH: loop header
LB: loop body
LE: loop exit
PB: predicated region body
PF: predicated region fallthrough
CT: control target
= control target key end

     0   :  { %8 = vsyncpa [#allocation3], 0  ;;  %s257_s15 = smov [#allocation2]   ;;  %s258_s17 = smov 128   ;;  %s320_s0 = inlined_call_operand.hbm [shape: bf16[2,32,256], index: 0, kind: input, shape index: {}]   ;;  %s321_s1 = inlined_call_operand.vmem [shape: bf16[12,32], index: 1, kind: input, shape index: {}]   ;;  %s322_s2 = inlined_call_operand.vmem [shape: f32[12,1], index: 2, kind: input, shape index: {}]   ;;  %s323_s3 = inlined_call_operand.vmem [shape: f32[2,12,256], index: 3, kind: output, shape index: {}]  }
   0x1   :  { %s13_s14 = sshll.u32 %s320_s0, 4  ;;  %s15_s16 = sshll.u32 %s257_s15, 4  ;;  %s14_s14 = int_to_ptr.hbm [resolvable:$true] %s13_s14  ;;  %s16_s16 = int_to_ptr.vmem [resolvable:$true] %s15_s16 }
   0x2   :  { %s259_s18 = smov 8  }
   0x3   :  { %21 = dma.hbm_to_vmem [thread:$0]  %s14_s14, 1024, %s16_s16, [#allocation3], %s258_s17, %s258_s17, %s259_s18  }
   0x4   :  { %255 = dma.done.wait [#allocation3], 1024  }
   0x5   :  { %256 = vsyncadd [#allocation3], 4294966272  ;;  %v260_v0 = vmov 0   ;;  %v187_v1 = vld [vmem:[#allocation2 + $0x10] sm:$0xf]  ;;  %v33_v28 = vld [vmem:[%s322_s2] sm:$0xff] }
   0x6   :  { %230 = vset.pattern.permute.xlu0 %v260_v0  ;;  %v221_v2 = vld [vmem:[#allocation2 + $0x14] sm:$0xf0]  ;;  %v220_v3 = vld [vmem:[#allocation2 + $0x14] sm:$0xf]  ;;  %v189_v5 = vld [vmem:[#allocation2 + $0x18] sm:$0xf0] }
   0x7   :  { %v188_v4 = vor.u32 %v221_v2, %v187_v1  ;;  %v205_v6 = vld [vmem:[#allocation2 + $0x30] sm:$0xf]  ;;  %v225_v7 = vld [vmem:[#allocation2 + $0x34] sm:$0xf0]  ;;  %v192_v8 = vor.u32 %v220_v3, %v189_v5  ;;  %v224_v10 = vld [vmem:[#allocation2 + $0x34] sm:$0xf]  ;;  %41 = vperm.xlu0 %230, %v33_v28  }
   0x8   :  { %v206_v9 = vor.u32 %v225_v7, %v205_v6  ;;  %v207_v11 = vld [vmem:[#allocation2 + $0x38] sm:$0xf0]  ;;  %v179_v12 = vld [vmem:[#allocation2] sm:$0xf]  ;;  %v219_v14 = vld [vmem:[#allocation2 + $0x4] sm:$0xf0] }
   0x9   :  { %84 = vmatpush.bf16.msra.mxu0 %v188_v4  ;;  %v210_v13 = vor.u32 %v224_v10, %v207_v11  ;;  %v218_v15 = vld [vmem:[#allocation2 + $0x4] sm:$0xf]  ;;  %v181_v16 = vld [vmem:[#allocation2 + $0x8] sm:$0xf0]  ;;  %98 = vmatpush.bf16.msra.mxu1 %v192_v8  ;;  %v180_v17 = vor.u32 %v219_v14, %v179_v12  ;;  %v197_v19 = vld [vmem:[#allocation2 + $0x20] sm:$0xf] }
   0xa   :  { %141 = vmatpush.bf16.msra.mxu2 %v206_v9  ;;  %v184_v18 = vor.u32 %v218_v15, %v181_v16  ;;  %v223_v20 = vld [vmem:[#allocation2 + $0x24] sm:$0xf0]  ;;  %v222_v21 = vld [vmem:[#allocation2 + $0x24] sm:$0xf]  ;;  %v199_v23 = vld [vmem:[#allocation2 + $0x28] sm:$0xf0] }
   0xb   :  { %155 = vmatpush.bf16.msra.mxu3 %v210_v13  ;;  %v198_v22 = vor.u32 %v223_v20, %v197_v19  ;;  %v175_v24 = vld [vmem:[%s321_s1] sm:$0xf]  ;;  %v217_v25 = vld [vmem:[%s321_s1] sm:$0x30]  ;;  %v202_v26 = vor.u32 %v222_v21, %v199_v23  ;;  %vm74_vm0 = vcmask 261120  }
   0xc   :  { %v176_v27 = vor.u32 %v217_v25, %v175_v24  ;;  %v34_v29 = vld [vmem:[%s322_s2 + $0x8] sm:$0xf] }
   0xd   :  { %85 = vmatpush.bf16.msra.mxu0 %v180_v17  ;;  %99 = vmatpush.bf16.msra.mxu1 %v184_v18 }
   0xe   :  { %142 = vmatpush.bf16.msra.mxu2 %v198_v22 }
   0xf   :  { %156 = vmatpush.bf16.msra.mxu3 %v202_v26  ;;  %46 = vperm.xlu0 %230, %v34_v29  }
  0x10   :  { %193 = vmatmul.msk.bf16.vlgmr.msra.gmra.mxu0 %vm74_vm0, %v176_v27  ;;  %194 = vmatmul.msk.bf16.vlgmr.msra.gmra.mxu1 %vm74_vm0, %v176_v27 }
  0x11   :  { %211 = vmatmul.msk.bf16.vlgmr.msra.gmra.mxu2 %vm74_vm0, %v176_v27 }
  0x12   :  { %212 = vmatmul.msk.bf16.vlgmr.msra.gmra.mxu3 %vm74_vm0, %v176_v27 }
  0x79   :  { %v42_v30 = vpop.permute.xlu0 %41 }
  0x81   :  { %v47_v35 = vpop.permute.xlu0 %46 }
  0x8d   :  { %v87_v31 = vpop.f32.mrf.mxu0  ;;  %v101_v33 = vpop.f32.mrf.mxu1 }
  0x8e   :  { %v88_v32 = vadd.f32 %v87_v31, %v42_v30  ;;  %v102_v34 = vadd.f32 %v101_v33, %v42_v30 }
  0x90   :  { %106 = vst [vmem:[%s323_s3] sm:$0xff] %v88_v32 }
  0x91   :  { %107 = vst [vmem:[%s323_s3 + $0x8] sm:$0xff] %v102_v34 }
  0x94   :  { %v144_v36 = vpop.f32.mrf.mxu2 }
  0x95   :  { %v145_v37 = vadd.f32 %v144_v36, %v42_v30  ;;  %v158_v38 = vpop.f32.mrf.mxu3  ;;  %v89_v39 = vpop.f32.mrf.mxu0 }
  0x96   :  { %v159_v40 = vadd.f32 %v158_v38, %v42_v30  ;;  %v90_v41 = vadd.f32 %v89_v39, %v47_v35  ;;  %v103_v42 = vpop.f32.mrf.mxu1 }
  0x97   :  { %213 = vst [vmem:[%s323_s3 + $0x20] sm:$0xff] %v145_v37  ;;  %v104_v43 = vadd.f32 %v103_v42, %v47_v35 }
  0x98   :  { %214 = vst [vmem:[%s323_s3 + $0x28] sm:$0xff] %v159_v40 }
  0x99   :  { %108 = vst [vmem:[%s323_s3 + $0x10] sm:$0xf] %v90_v41 }
  0x9a   :  { %109 = vst [vmem:[%s323_s3 + $0x18] sm:$0xf] %v104_v43 }
  0x9c   :  { %v146_v44 = vpop.f32.mrf.mxu2 }
  0x9d   :  { %v147_v45 = vadd.f32 %v146_v44, %v47_v35  ;;  %v160_v46 = vpop.f32.mrf.mxu3 }
  0x9e   :  { %v161_v47 = vadd.f32 %v160_v46, %v47_v35 }
  0x9f   :  { %215 = vst [vmem:[%s323_s3 + $0x30] sm:$0xf] %v147_v45 }
  0xa0   :  { %216 = vst [vmem:[%s323_s3 + $0x38] sm:$0xf] %v161_v47 }
  0xa1   :  { %172 = vsyncpa [#allocation3], 1 }

</bundles_post_ra>
